<compile_context>
chip_gen: v7x
topology: tpu7x:2x2x1
jax: 0.10.0
libtpu: 0.0.40
codegen_flags: <defaults>
</compile_context>

<pallas_src>
import functools

import jax
import jax.numpy as jnp
from jax import lax
from jax.experimental import pallas as pl
from jax.experimental.pallas import tpu as pltpu

FACTORS = [1, 1, 1, 1 / 2, 1 / 4, 1 / 8, 1 / 16, 1 / 32, 1 / 64]
LEAKY_SLOPE = 0.2
_ACC_BYTES_CAP = 128 * 1024        # f32 accumulator cap (<= ~half the 64 x 4KiB vreg file)


# --------------------------------------------------------------------------------------
# Hardware-aware helpers
# --------------------------------------------------------------------------------------

@functools.lru_cache(maxsize=None)
def _vmem_limit_bytes():
    """Generation-aware scoped-VMEM limit: ~3/4 of physical (96 MiB v5e/v6e, 48 MiB v7x)."""
    cap = 64 * 1024 * 1024
    try:
        cap = int(pltpu.get_tpu_info().vmem_capacity_bytes)
    except Exception:
        pass
    return int(min((cap * 3) // 4, 112 * 1024 * 1024))


def _padded_bytes(rows, w, c, itemsize):
    """VMEM bytes of an (..., rows, w, c) block after (sublane, lane) tiling/padding."""
    sub = 8 * (4 // itemsize)                    # 8 for f32, 16 for bf16
    w_pad = -(-w // sub) * sub
    c_pad = -(-c // 128) * 128
    return rows * w_pad * c_pad * itemsize


def _largest_divisor_leq(x, cap, *, even=False):
    step = 2 if even else 1
    divs = [d for d in range(step, x + 1, step) if x % d == 0]
    if not divs:
        return x
    fits = [d for d in divs if d <= cap]
    return max(fits) if fits else min(divs)


def _cout_tile(cout):
    for t in (256, 128):
        if cout % t == 0:
            return t
    return cout


def _plan_row_tile(ho, kh, kw, win, cin, wo_out, tn, pooling, has_fade, vmem_limit):
    """Conv-output rows per grid step: the largest divisor of `ho` whose double-buffered
    x-strip / out / fade blocks (padded layout) fit the VMEM budget, kept small enough that
    (a) the x strip stays a few MiB and (b) images with >= 16 rows get at least two row
    tiles so the HBM<->VMEM DMA pipeline has something to overlap."""
    step = 2 if pooling else 1
    divs = [d for d in range(step, ho + 1, step) if ho % d == 0]
    if not divs:
        return ho
    fixed = 2 * _padded_bytes(kh * kw, cin, tn, 2) + 64 * 1024   # resident weights + slack

    def vmem_need(th):
        xin = 2 * _padded_bytes(th + kh - 1, win, cin, 2)
        out = 2 * _padded_bytes(th // 2 if pooling else th, wo_out, tn, 2)
        return fixed + xin + out + (out if has_fade else 0)

    budget = int(vmem_limit * 0.85)
    strip_cap = 4 * 1024 * 1024
    row_cap = ho if ho < 16 else ho // 2
    good = [d for d in divs
            if d <= row_cap and vmem_need(d) <= budget
            and _padded_bytes(d + kh - 1, win, cin, 2) <= strip_cap]
    if good:
        return max(good)
    fits = [d for d in divs if vmem_need(d) <= budget]
    return max(fits) if fits else min(divs)


@functools.lru_cache(maxsize=None)
def _halo_tiling_supported():
    """Probe whether pl.Element halo windows (overlapping row strips at element offsets)
    lower on this backend; if not, kh>1 convs fall back to untiled H."""
    def _probe(x_ref, o_ref):
        o_ref[...] = x_ref[:, pl.ds(0, 8), :, :]

    try:
        x = jnp.arange(2 * 18 * 8 * 128, dtype=jnp.float32).reshape(2, 18, 8, 128)
        out = pl.pallas_call(
            _probe,
            grid=(2, 2),
            in_specs=[pl.BlockSpec((1, pl.Element(10), 8, 128),
                                   lambda n, h: (n, h * 8, 0, 0))],
            out_specs=pl.BlockSpec((1, 8, 8, 128), lambda n, h: (n, h, 0, 0)),
            out_shape=jax.ShapeDtypeStruct((2, 16, 8, 128), jnp.float32),
        )(x)
        return bool(jnp.all(out == x[:, :16]))
    except Exception:
        return False


# --------------------------------------------------------------------------------------
# Conv kernel (row-grouped tap matmuls, fused bias/LeakyReLU/pool/fade epilogue)
# --------------------------------------------------------------------------------------

def _wsconv_kernel(*refs, kh, kw, row_group, w_chunk, apply_leaky, pool, fuse_fade):
    """One grid step = one batch image x one cout tile x one row tile.

    refs (in order):
      x_ref     (1, TH + kh - 1, Win, Cin)  bf16   (eq-LR scale pre-folded into the weights)
      w_ref     (kh*kw, Cin, TN)            bf16
      b_ref     (1, TN)                     f32
      fade_ref  (1, TH_out, Wout, TN)              (only if fuse_fade)
      alpha_ref (1,) in SMEM                       (only if fuse_fade)
      o_ref     (1, TH_out, Wout, TN)
    """
    if fuse_fade:
        x_ref, w_ref, b_ref, fade_ref, alpha_ref, o_ref = refs
    else:
        x_ref, w_ref, b_ref, o_ref = refs
        fade_ref = alpha_ref = None

    th_in, win, cin = x_ref.shape[1], x_ref.shape[2], x_ref.shape[3]
    tn = o_ref.shape[3]
    th = th_in - kh + 1                 # conv-output rows in this tile
    wo = win - kw + 1                   # conv-output cols
    pooling = pool is not None
    rg, wc = row_group, w_chunk
    n_groups = th // rg
    n_chunks = wo // wc
    org = rg // 2 if pooling else rg    # output rows per group
    owc = wc // 2 if pooling else wc    # output cols per chunk

    bias = b_ref[...].astype(jnp.float32)          # (1, TN) broadcasts over (rg, wc, TN)

    def leaky(v):
        return jnp.where(v > 0, v, LEAKY_SLOPE * v) if apply_leaky else v

    def pool2(v):
        # 2x2 average pool on a (rg, wc, TN) group: pairwise row adds + sublane pair adds.
        # Stays on the VPU/XLU so the MXU only does the conv matmuls.
        v = v.reshape(rg // 2, 2, wc, tn).sum(axis=1)
        v = v.reshape(rg // 2, wc // 2, 2, tn).sum(axis=2)
        return v * 0.25

    def do_group(r0, out_r0):
        for c in range(n_chunks):
            w0 = c * wc
            # One (rg*wc, Cin) x (Cin, TN) matmul per tap; acc <= ~128 KiB by construction.
            acc = jnp.zeros((rg * wc, tn), jnp.float32)
            for t in range(kh * kw):
                i, j = divmod(t, kw)
                xs = x_ref[0, pl.ds(r0 + i, rg), pl.ds(w0 + j, wc), :]
                acc = acc + jnp.dot(xs.reshape(rg * wc, cin), w_ref[t],
                                    preferred_element_type=jnp.float32)
            y = acc.reshape(rg, wc, tn)
            if pool == "post":            # Conv_Block output: avg_pool(leaky(conv + b))
                out = pool2(leaky(y + bias))
            elif pool == "pre":           # downscale-RGB path: leaky(avg_pool(conv) + b)
                out = leaky(pool2(y) + bias)
            else:
                out = leaky(y + bias)
            ow0 = c * owc
            if fuse_fade:
                a = alpha_ref[0]
                prev = fade_ref[0, pl.ds(out_r0, org), pl.ds(ow0, owc), :].astype(jnp.float32)
                out = a * out + (1.0 - a) * prev
            o_ref[0, pl.ds(out_r0, org), pl.ds(ow0, owc), :] = out.astype(o_ref.dtype)

    if n_groups <= 4:                     # short: fully unroll (LLO scheduler visibility)
        for g in range(n_groups):
            do_group(g * rg, g * org)
    else:                                 # long: keep code size bounded
        def body(g, carry):
            do_group(g * rg, g * org)
            return carry
        lax.fori_loop(0, n_groups, body, 0)


# --------------------------------------------------------------------------------------
# Wrapper
# --------------------------------------------------------------------------------------

def ws_conv2d(x, w, b, *, padding=0, apply_leaky=False, pool=None,
              fade=None, alpha=None, out_dtype=jnp.bfloat16, gain=2.0):
    """Weighted-scale (equalized-LR) conv2d, stride 1.  x: NHWC, w: HWIO, b: (Cout,).

    pool: None | "pre" (2x2 avg-pool before activation) | "post" (after activation).
    fade/alpha: optional fused  alpha*out + (1-alpha)*fade  epilogue (alpha read from SMEM).
    """
    n = x.shape[0]
    kh, kw, cin, cout = w.shape
    scale = float((gain / (cin * kh * kw)) ** 0.5)
    if padding:
        # TODO(synk): the explicit zero-pad is an extra HBM round trip of the activation map;
        # folding the 1-pixel border into the kernel (edge masking / pre-padded producer
        # outputs) would remove it on the memory-bound high-res layers.
        x = jnp.pad(x, ((0, 0), (padding, padding), (padding, padding), (0, 0)))
    x = x.astype(jnp.bfloat16)
    hin, win = x.shape[1], x.shape[2]
    ho, wo = hin - kh + 1, win - kw + 1
    pooling = pool is not None
    ho_out, wo_out = (ho // 2, wo // 2) if pooling else (ho, wo)

    tn = _cout_tile(cout)
    ct = cout // tn
    vmem_limit = _vmem_limit_bytes()

    th = _plan_row_tile(ho, kh, kw, win, cin, wo_out, tn, pooling, fade is not None, vmem_limit)
    if kh > 1 and th < ho and not _halo_tiling_supported():
        th = ho                                    # untiled-H fallback (no halo windows)
    ht = ho // th
    th_in = th + kh - 1
    th_out = th // 2 if pooling else th

    # MXU M-tile = row_group * w_chunk rows of the implicit im2col matrix, bounded so the
    # f32 accumulator stays <= _ACC_BYTES_CAP (avoids spilling the vreg file).
    m_cap = max(1, _ACC_BYTES_CAP // (4 * tn))
    w_chunk = _largest_divisor_leq(wo, m_cap, even=pooling)
    row_group = _largest_divisor_leq(th, max(1, m_cap // w_chunk), even=pooling)

    # Equalized-LR scale folded into the bf16 weights (saves a VALU multiply per element).
    w3 = (w.reshape(kh * kw, cin, cout) * scale).astype(jnp.bfloat16)
    b2 = b.reshape(1, cout).astype(jnp.float32)

    if kh > 1 and ht > 1:
        # Halo row tiling: overlapping (th + kh - 1)-row input windows at element offsets hh*th.
        x_spec = pl.BlockSpec((1, pl.Element(th_in), win, cin),
                              lambda nn, cc, hh: (nn, hh * th, 0, 0))
    else:
        x_spec = pl.BlockSpec((1, th_in if kh > 1 else th, win, cin),
                              lambda nn, cc, hh: (nn, hh, 0, 0))

    # Row axis innermost in the grid: the weight / bias blocks (index depends only on cc)
    # stay resident in VMEM across the whole row stream (no per-step re-fetch).
    in_specs = [
        x_spec,
        pl.BlockSpec((kh * kw, cin, tn), lambda nn, cc, hh: (0, 0, cc)),
        pl.BlockSpec((1, tn), lambda nn, cc, hh: (0, cc)),
    ]
    args = [x, w3, b2]
    fuse_fade = fade is not None
    if fuse_fade:
        assert fade.shape == (n, ho_out, wo_out, cout), (fade.shape, (n, ho_out, wo_out, cout))
        in_specs.append(pl.BlockSpec((1, th_out, wo_out, tn),
                                     lambda nn, cc, hh: (nn, hh, 0, cc)))
        args.append(fade)
        in_specs.append(pl.BlockSpec(memory_space=pltpu.MemorySpace.SMEM))
        args.append(jnp.asarray(alpha, jnp.float32).reshape(1))

    kern = functools.partial(_wsconv_kernel, kh=kh, kw=kw, row_group=row_group,
                             w_chunk=w_chunk, apply_leaky=apply_leaky, pool=pool,
                             fuse_fade=fuse_fade)

    out_itemsize = jnp.dtype(out_dtype).itemsize
    bytes_accessed = int(x.size * 2 + w3.size * 2 + b2.size * 4
                         + n * ho_out * wo_out * cout * out_itemsize
                         + ((fade.size * fade.dtype.itemsize + 4) if fuse_fade else 0))
    flops = int(2 * n * ho * wo * cin * kh * kw * cout)

    return pl.pallas_call(
        kern,
        grid=(n, ct, ht),
        in_specs=in_specs,
        out_specs=pl.BlockSpec((1, th_out, wo_out, tn), lambda nn, cc, hh: (nn, hh, 0, cc)),
        out_shape=jax.ShapeDtypeStruct((n, ho_out, wo_out, cout), out_dtype),
        compiler_params=pltpu.CompilerParams(
            # TODO(synk): on v7x, mark the batch/cout axis pltpu.CORE_PARALLEL if "parallel"
            # alone does not shard the grid across the two TensorCores.
            dimension_semantics=("parallel", "parallel", "arbitrary"),
            vmem_limit_bytes=vmem_limit),
        cost_estimate=pl.CostEstimate(flops=flops, transcendentals=0,
                                      bytes_accessed=bytes_accessed),
    )(*args)


# --------------------------------------------------------------------------------------
# Minibatch standard-deviation statistic
# --------------------------------------------------------------------------------------

def _minibatch_std_kernel(x_ref, o_ref):
    """mean over (C,H,W) of the per-element std over the batch dim (unbiased)."""
    x = x_ref[...].astype(jnp.float32)                 # (N, H, W, C)
    n, h, w, c = x.shape
    mu = jnp.mean(x, axis=0, keepdims=True)
    denom = max(n - 1, 1)   # torch.std is unbiased; guard batch==1 (torch would yield NaN)
    var = jnp.sum((x - mu) ** 2, axis=0) / denom
    std = jnp.sqrt(var)                                # (H, W, C)
    s = jnp.sum(std, axis=2, keepdims=True)
    s = jnp.sum(s, axis=1, keepdims=True)
    s = jnp.sum(s, axis=0, keepdims=True)              # (1, 1, 1)
    o_ref[...] = (s / float(h * w * c))[0]             # (1, 1)


def minibatch_std(x):
    n, h, w, _ = x.shape
    stat = pl.pallas_call(
        _minibatch_std_kernel,
        out_shape=jax.ShapeDtypeStruct((1, 1), jnp.float32),
        in_specs=[pl.BlockSpec(memory_space=pltpu.MemorySpace.VMEM)],
        out_specs=pl.BlockSpec(memory_space=pltpu.MemorySpace.VMEM),
    )(x)
    # TODO(synk): the +1-channel concat stays in XLA; fusing it into the first final_block
    # conv would require per-tap border masking of the padded constant plane (tail is 4x4).
    extra = jnp.broadcast_to(stat.reshape(1, 1, 1, 1).astype(x.dtype), (n, h, w, 1))
    return jnp.concatenate([x, extra], axis=-1)


# --------------------------------------------------------------------------------------
# Parameters (deterministic synthetic init, mirrors the PyTorch __init__ shapes)
# --------------------------------------------------------------------------------------

def _init_conv(key, kh, kw, cin, cout):
    k_w, k_b = jax.random.split(key)
    return {
        "w": jax.random.normal(k_w, (kh, kw, cin, cout), jnp.float32) * 0.1,
        "b": jax.random.normal(k_b, (cout,), jnp.float32) * 0.1,
    }


def init_discriminator_params(key, in_channels, img_channels=3):
    params = {"prog_blocks": [], "rgb_layers": []}
    keys = jax.random.split(key, 64)
    ki = 0
    for i in range(len(FACTORS) - 1, 0, -1):
        cin = int(in_channels * FACTORS[i])
        cout = int(in_channels * FACTORS[i - 1])
        params["prog_blocks"].append({
            "conv1": _init_conv(keys[ki], 3, 3, cin, cout),
            "conv2": _init_conv(keys[ki + 1], 3, 3, cout, cout),
        })
        ki += 2
        params["rgb_layers"].append(_init_conv(keys[ki], 1, 1, img_channels, cin))
        ki += 1
    # initial_rgb is appended last, exactly as in the PyTorch module
    params["rgb_layers"].append(_init_conv(keys[ki], 1, 1, img_channels, in_channels))
    ki += 1
    params["final_block"] = [
        _init_conv(keys[ki], 3, 3, in_channels + 1, in_channels),
        _init_conv(keys[ki + 1], 4, 4, in_channels, in_channels),
        _init_conv(keys[ki + 2], 1, 1, in_channels, 1),
    ]
    return params


# --------------------------------------------------------------------------------------
# Forward pass (mirrors Discriminator.forward)
# --------------------------------------------------------------------------------------

def conv_block(p, x, *, pool_second=False, fade=None, alpha=None):
    x = ws_conv2d(x, p["conv1"]["w"], p["conv1"]["b"], padding=1, apply_leaky=True)
    x = ws_conv2d(x, p["conv2"]["w"], p["conv2"]["b"], padding=1, apply_leaky=True,
                  pool="post" if pool_second else None, fade=fade, alpha=alpha)
    return x


def discriminator_forward(params, x_nchw, alpha, steps):
    x = jnp.transpose(x_nchw, (0, 2, 3, 1)).astype(jnp.bfloat16)   # NCHW -> NHWC (glue)
    n_blocks = len(params["prog_blocks"])
    current_step = n_blocks - steps

    rgb = params["rgb_layers"][current_step]
    out = ws_conv2d(x, rgb["w"], rgb["b"], apply_leaky=True)

    if steps > 0:
        # leaky(rgb(avg_pool(x))) == leaky(avg_pool(rgb_linear(x))): the 2x2 pool is fused
        # into the 1x1 RGB conv's epilogue ("pre" = pool before the activation).
        rgb_next = params["rgb_layers"][current_step + 1]
        downscaled = ws_conv2d(x, rgb_next["w"], rgb_next["b"],
                               apply_leaky=True, pool="pre")
        # conv_block -> LeakyReLU -> 2x2 avg-pool -> alpha fade: pool + fade fused into
        # the epilogue of the block's second conv.
        out = conv_block(params["prog_blocks"][current_step], out,
                         pool_second=True, fade=downscaled, alpha=alpha)
        for step in range(current_step + 1, n_blocks):
            out = conv_block(params["prog_blocks"][step], out, pool_second=True)

    out = minibatch_std(out)
    f0, f1, f2 = params["final_block"]
    out = ws_conv2d(out, f0["w"], f0["b"], padding=1, apply_leaky=True)
    out = ws_conv2d(out, f1["w"], f1["b"], apply_leaky=True)
    out = ws_conv2d(out, f2["w"], f2["b"], apply_leaky=False, out_dtype=jnp.float32)
    return out.reshape(out.shape[0], -1)


# --------------------------------------------------------------------------------------
# Demo
# --------------------------------------------------------------------------------------

if __name__ == "__main__":
    IN_CHANNELS = 64      # int(IN_CHANNELS * factor) >= 1 for every factor
    IMG_CHANNELS = 3
    BATCH = 2
    STEPS = 2             # input resolution = 4 * 2**STEPS = 16
    ALPHA = 0.5
    spatial = 4 * (2 ** STEPS)

    key = jax.random.PRNGKey(0)
    k_params, k_x = jax.random.split(key)
    params = init_discriminator_params(k_params, IN_CHANNELS, IMG_CHANNELS)
    x = jax.random.normal(k_x, (BATCH, IMG_CHANNELS, spatial, spatial), jnp.float32)

    out = discriminator_forward(params, x, ALPHA, STEPS)
    out = jax.block_until_ready(out)

    assert out.shape == (BATCH, 1), out.shape
    assert bool(jnp.all(jnp.isfinite(out)))
    print("KERNEL_OK")
</pallas_src>

<mosaic_0001>
module attributes {stable_mosaic.version = 11 : i64} {
  func.func @_wsconv_kernel(%arg0: i32, %arg1: i32, %arg2: i32, %arg3: memref<1x8x16x3xbf16, #tpu.memory_space<vmem>>, %arg4: memref<1x3x64xbf16, #tpu.memory_space<vmem>>, %arg5: memref<1x64xf32, #tpu.memory_space<vmem>>, %arg6: memref<1x8x16x64xbf16, #tpu.memory_space<vmem>>) attributes {dimension_semantics = [#tpu.dimension_semantics<parallel>, #tpu.dimension_semantics<parallel>, #tpu.dimension_semantics<arbitrary>], iteration_bounds = array<i64: 2, 1, 2>, scalar_prefetch = 0 : i64, scratch_operands = 0 : i64, tpu.core_type = #tpu.core_type<tc>, window_params = [{transform_indices = @transform_0, window_bounds = array<i64: 1, 8, 16, 3>}, {transform_indices = @transform_1, window_bounds = array<i64: 1, 3, 64>}, {transform_indices = @transform_2, window_bounds = array<i64: 1, 64>}, {transform_indices = @transform_3, window_bounds = array<i64: 1, 8, 16, 64>}]} {
    %c0 = arith.constant 0 : index
    %c0_0 = arith.constant 0 : index
    %0 = vector.load %arg5[%c0, %c0_0] : memref<1x64xf32, #tpu.memory_space<vmem>>, vector<1x64xf32>
    %cst = arith.constant 0.000000e+00 : f32
    %1 = vector.broadcast %cst : f32 to vector<128x64xf32>
    %c0_1 = arith.constant 0 : index
    %c0_2 = arith.constant 0 : index
    %c0_3 = arith.constant 0 : index
    %c0_4 = arith.constant 0 : index
    %2 = vector.load %arg3[%c0_1, %c0_2, %c0_3, %c0_4] : memref<1x8x16x3xbf16, #tpu.memory_space<vmem>>, vector<1x8x16x3xbf16>
    %3 = vector.shape_cast %2 : vector<1x8x16x3xbf16> to vector<8x16x3xbf16>
    %4 = vector.shape_cast %3 : vector<8x16x3xbf16> to vector<128x3xbf16>
    %c0_5 = arith.constant 0 : index
    %c0_6 = arith.constant 0 : index
    %c0_7 = arith.constant 0 : index
    %5 = vector.load %arg4[%c0_5, %c0_6, %c0_7] : memref<1x3x64xbf16, #tpu.memory_space<vmem>>, vector<1x3x64xbf16>
    %6 = vector.shape_cast %5 : vector<1x3x64xbf16> to vector<3x64xbf16>
    %cst_8 = arith.constant dense<0.000000e+00> : vector<128x64xf32>
    %7 = tpu.matmul %4, %6, %cst_8 {dimension_numbers = #tpu.dot_dimension_numbers<[1], [0], [0], [1], [0, 0, 1, 1], [], []>} : vector<128x3xbf16>, vector<3x64xbf16>, vector<128x64xf32> -> vector<128x64xf32>
    %8 = arith.addf %1, %7 : vector<128x64xf32>
    %9 = vector.shape_cast %8 : vector<128x64xf32> to vector<8x16x64xf32>
    %10 = vector.shape_cast %0 : vector<1x64xf32> to vector<1x1x64xf32>
    %11 = vector.broadcast %10 : vector<1x1x64xf32> to vector<8x16x64xf32>
    %12 = arith.addf %9, %11 : vector<8x16x64xf32>
    %cst_9 = arith.constant 0.000000e+00 : f32
    %13 = vector.broadcast %cst_9 : f32 to vector<8x16x64xf32>
    %14 = arith.cmpf ogt, %12, %13 : vector<8x16x64xf32>
    %cst_10 = arith.constant 2.000000e-01 : f32
    %15 = vector.broadcast %cst_10 : f32 to vector<8x16x64xf32>
    %16 = arith.mulf %15, %12 : vector<8x16x64xf32>
    %17 = arith.select %14, %12, %16 : vector<8x16x64xi1>, vector<8x16x64xf32>
    %18 = arith.truncf %17 : vector<8x16x64xf32> to vector<8x16x64xbf16>
    %c0_11 = arith.constant 0 : index
    %c0_12 = arith.constant 0 : index
    %c0_13 = arith.constant 0 : index
    %c0_14 = arith.constant 0 : index
    %19 = vector.load %arg6[%c0_11, %c0_12, %c0_13, %c0_14] : memref<1x8x16x64xbf16, #tpu.memory_space<vmem>>, vector<1x8x16x64xbf16>
    %20 = vector.shape_cast %19 : vector<1x8x16x64xbf16> to vector<8x16x64xbf16>
    %21 = vector.shape_cast %18 : vector<8x16x64xbf16> to vector<1x8x16x64xbf16>
    tpu.vector_store %arg6[%c0_11, %c0_12, %c0_13, %c0_14], %21 {strides = array<i32>} : memref<1x8x16x64xbf16, #tpu.memory_space<vmem>>, vector<1x8x16x64xbf16>,
    return
  }
  func.func @transform_0(%arg0: i32, %arg1: i32, %arg2: i32) -> (i32, i32, i32, i32) {
    %c0_i32 = arith.constant 0 : i32
    %c0_i32_0 = arith.constant 0 : i32
    %c0_i32_1 = arith.constant 0 : i32
    return %arg0, %arg2, %c0_i32, %c0_i32_0 : i32, i32, i32, i32
  }
  func.func @transform_1(%arg0: i32, %arg1: i32, %arg2: i32) -> (i32, i32, i32) {
    %c0_i32 = arith.constant 0 : i32
    %c0_i32_0 = arith.constant 0 : i32
    %c0_i32_1 = arith.constant 0 : i32
    return %c0_i32, %c0_i32_0, %arg1 : i32, i32, i32
  }
  func.func @transform_2(%arg0: i32, %arg1: i32, %arg2: i32) -> (i32, i32) {
    %c0_i32 = arith.constant 0 : i32
    %c0_i32_0 = arith.constant 0 : i32
    return %c0_i32, %arg1 : i32, i32
  }
  func.func @transform_3(%arg0: i32, %arg1: i32, %arg2: i32) -> (i32, i32, i32, i32) {
    %c0_i32 = arith.constant 0 : i32
    %c0_i32_0 = arith.constant 0 : i32
    return %arg0, %arg2, %c0_i32, %arg1 : i32, i32, i32, i32
  }
}

</mosaic_0001>

<bundles_post_ra>
// kernel: tpu_custom_call.1
= control target key start
LH: loop header
LB: loop body
LE: loop exit
PB: predicated region body
PF: predicated region fallthrough
CT: control target
= control target key end

     0   :  { %8 = vsyncpa [#allocation3], 0  ;;  %s1227_s0 = inlined_call_operand.vmem [shape: bf16[2,16,16,3], index: 0, kind: input, shape index: {}]   ;;  %s1228_s1 = inlined_call_operand.vmem [shape: bf16[1,3,64], index: 1, kind: input, shape index: {}]   ;;  %s1229_s2 = inlined_call_operand.vmem [shape: f32[1,64], index: 2, kind: input, shape index: {}]   ;;  %s1230_s3 = inlined_call_operand.hbm [shape: bf16[2,16,16,64], index: 3, kind: output, shape index: {}]  }
   0x1   :  { %10 = vsyncpa [#allocation3 + $0x1], 0  ;;  %s1016_s12 = smov 0   ;;  %s1018_s13 = smov 0  }
   0x2   :  { %s1020_s14 = smov 0   ;;  %s1022_s15 = smov 0  }
   0x3   :  { %s1024_s16 = smov 0   ;;  %s1026_s17 = smov 0  }
   0x4   :  { %s1028_s18 = smov 0   ;;  %s1030_s19 = smov 0  }
   0x5 LB: > { %s716_s20 = sadd.s32 4294967295, %s990_s19   ;;  %s717_s21 = sadd.s32 4294967294, %s990_s19   ;;  %s990_s19 = sphi %s1030_s19, %s16_s19   ;;  %s986_s18 = sphi %s1028_s18, %s1239_s18   ;;  %s982_s17 = sphi %s1026_s17, %s1238_s17   ;;  %s978_s16 = sphi %s1024_s16, %s1237_s16   ;;  %s974_s15 = sphi %s1022_s15, %s1236_s15   ;;  %s970_s14 = sphi %s1020_s14, %s1235_s14   ;;  %s966_s13 = sphi %s1018_s13, %s1234_s13   ;;  %s962_s12 = sphi %s1016_s12, %s1233_s12  }
   0x6   : > { %s28_s22 = sadd.s32 1, %s982_s17  ;;  %s35_s23 = sadd.s32 1, %s986_s18 }
   0x7   : > { %p29_p0 = scmp.ge.s32.totalorder %s28_s22, 2  ;;  %p136_p1 = scmp.ne.s32.totalorder %s970_s14, %s966_s13 }
   0x8   : > { %p137_p2 = scmp.eq.s32.totalorder %s716_s20, 3  ;;  %p142_p5 = scmp.ne.s32.totalorder %s966_s13, %s962_s12 }
   0x9   : > { %s1241_s22 = smov (%p29_p0, %s28_s22), 0  ;;  %s1243_s23 = smov (!%p29_p0, %s35_s23), %s986_s18 }
   0xa   : > { %s120_s24 = ssub.s32 %s982_s17, %s1241_s22  ;;  %p1067_p3 = por %p137_p2, %p136_p1 }
   0xb   : > { %p37_p4 = scmp.ge.s32.totalorder %s1243_s23, 2  ;;  %p143_p6 = scmp.eq.s32.totalorder %s717_s21, 3 }
   0xc   : > { %p722_p7 = scmp.ge.s32.totalorder %s990_s19, 1  ;;  %p188_p9 = scmp.lt.s32.totalorder %s990_s19, 5 }
   0xd   : > { %s1245_s23 = smov (%p37_p4, %s1243_s23), 0  ;;  %p1076_p8 = por %p143_p6, %p142_p5 }
   0xe   : > { %s119_s27 = ssub.s32 %s986_s18, %s1245_s23  ;;  %s126_s28 = sadd.s32 1, %s970_s14 }
   0xf   : > { %s121_s29 = sor.u32 %s120_s24, %s119_s27  ;;  %p189_p10 = pnand %p722_p7, %p188_p9 }
  0x10   : > { %p124_p11 = scmp.eq.s32.totalorder %s121_s29, 0  ;;  %v261_v0 = vld [vmem:[%s1228_s1] sm:$0x3] (!%p189_p10)  ;;  %vm327_vm0 = vcmask (!%p189_p10), 1040384   ;;  %vm328_vm1 = vcmask (!%p189_p10), 1041408   ;;  %s724_s6 = sshll.u32 (!%p189_p10), %s974_s15, 3 }
  0x11   : > { %192 = sbr.rel (%p189_p10) target bundleno = 285 (0x11d), region = 32  ;;  %v992_v1 = vmov (!%p189_p10), 65535   ;;  %p225_p12 = scmp.lt.s32.totalorder (!%p189_p10), %s978_s16, 1  ;;  %vm302_vm2 = vcmask (!%p189_p10), 23552   ;;  %v1107_v13 = vld [vmem:[%s1229_s2] ss:$0 sm:$0xff] (!%p189_p10) }
  0x12   : > { %s1085_s30 = scalar_select %p124_p11, %s970_s14, %s126_s28  }
  0x13   : > { %v329_v2 = vsel (!%p189_p10), %vm327_vm0, 4294967295, %v992_v1  ;;  %p227_p13 = scmp.lt.s32.totalorder (!%p189_p10), %s724_s6, 15  ;;  %s221_s29 = sand.u32 (!%p189_p10), 1, %s966_s13   ;;  %vm565_vm3 = vcmask (!%p189_p10), 519168  }
  0x14   : > { %v330_v3 = vsel (!%p189_p10), %vm328_vm1, %v329_v2, 0  ;;  %s723_s4 = sshll.u32 (!%p189_p10), %s221_s29, 6  ;;  %s1175_s20 = scalar_lea.sflag (!%p189_p10), [#allocation3], %s221_s29 }
  0x15   : > { %v332_v4 = vand.u32 (!%p189_p10), %v330_v3, %v261_v0  ;;  %s1118_s5 = scalar_lea.vmem (!%p189_p10), [#allocation2], %s723_s4 }
  0x17   : > { %794 = vmatprep.subr.bf16.mxu0 (!%p189_p10), %v332_v4  ;;  %812 = vmatprep.subr.bf16.mxu1 (!%p189_p10), %v332_v4 }
  0x18   : > { %s226_s7 = scalar_select %p225_p12, %s978_s16, 1  ;;  %795 = vmatpush3.bf16.msra.mxu0 %v332_v4  ;;  %813 = vmatpush3.bf16.msra.mxu1 %v332_v4 }
  0x19   : > { %s1247_s6 = smov (!%p227_p13, %s724_s6), 15 }
  0x1a   : > { %s726_s8 = sshll.u32 %s226_s7, 5  ;;  %s725_s9 = sshll.u32 %s1247_s6, 1 }
  0x1b   : > { %s231_s10 = sadd.s32 %s726_s8, %s725_s9  ;;  %s784_s6 = sshll.u32 %s974_s15, 4 }
  0x1c   : > { %s727_s11 = sshll.u32 %s231_s10, 2  ;;  %s764_s7 = sshll.u32 %s978_s16, 5 }
  0x1d   : > { %s233_s24 = scalar_lea.vmem %s1227_s0, %s727_s11  ;;  %s597_s15 = sadd.s32 %s784_s6, %s764_s7 }
  0x1e   : > { %v888_v5 = vld [vmem:[%s233_s24] sm:$0xff]   ;;  %v890_v7 = vld [vmem:[%s233_s24 + $0x8] sm:$0xff]   ;;  %v892_v9 = vld [vmem:[%s233_s24 + $0x10] sm:$0xff]   ;;  %s765_s16 = sshll.u32 %s597_s15, 6  ;;  %s600_s8 = sshll.u32 %s1118_s5, 4  ;;  %s1163_s8 = int_to_ptr.vmem [resolvable:$true] %s600_s8 }
  0x1f   : > { %v889_v6 = vld [vmem:[%s233_s24 + $0x20] sm:$0xff]   ;;  %796 = vmatprep.mubr.msk.bf16.mxu0 %vm302_vm2, %v888_v5  ;;  %v891_v8 = vld [vmem:[%s233_s24 + $0x28] sm:$0xff]   ;;  %v893_v10 = vld [vmem:[%s233_s24 + $0x30] sm:$0xff]   ;;  %s1161_s11 = scalar_lea.hbm %s1230_s3, %s765_s16  ;;  %s896_s21 = scalar_lea.vmem %s1163_s8, 1024 }
  0x20   : > { %804 = vmatprep.mubr.msk.bf16.mxu1 %vm302_vm2, %v889_v6  ;;  %797 = vmatmul.mubr.msk.bf16.vlgmr.msra.gmra.mrb[0].mxu0 %vm302_vm2, %v890_v7  ;;  %v894_v11 = vld [vmem:[%s233_s24 + $0x18] sm:$0xff]   ;;  %p897_p0 = scmp.ne.s32.totalorder %s1163_s8, %s896_s21 }
  0x21   : > { %805 = vmatmul.mubr.msk.bf16.vlgmr.msra.gmra.mrb[0].mxu1 %vm302_vm2, %v891_v8  ;;  %800 = vmatprep.mubr.msk.bf16.mxu0 %vm302_vm2, %v892_v9  ;;  %v895_v12 = vld [vmem:[%s233_s24 + $0x38] sm:$0xff]   ;;  %s993_s24 = smov [#allocation2]  }
  0x22   : > { %808 = vmatprep.mubr.msk.bf16.mxu1 %vm302_vm2, %v893_v10  ;;  %p898_p1 = pnand %p897_p0, %p1067_p3  ;;  %s900_s27 = sshll.u32 %s993_s24, 4  ;;  %s901_s27 = int_to_ptr.vmem [resolvable:$false] %s900_s27 }
  0x23   : > { %s902_s28 = scalar_lea.vmem %s901_s27, 2048  ;;  %p903_p4 = scmp.lt.s32.totalorder %s1163_s8, %s901_s27 }
  0x24   : > { %p899_p2 = pneg %p898_p1  ;;  %p904_p5 = scmp.lt.s32.totalorder %s902_s28, %s896_s21 }
  0x26   : > { %p905_p6 = por %p904_p5, %p903_p4 }
  0x28   : > { %801 = vmatmul.mubr.msk.bf16.gmra.mrb[4].mxu0 %vm302_vm2, %v894_v11  ;;  %p906_p7 = pnand %p905_p6, %p899_p2 }
  0x29   : > { %809 = vmatmul.mubr.msk.bf16.gmra.mrb[4].mxu1 %vm302_vm2, %v895_v12 }
  0xf3   : > { %v798_v14 = vpop.f32.mrb[0].mxu0 }
  0xf4   : > { %v439_v15 = vadd.f32 %v798_v14, %v1107_v13  ;;  %v806_v16 = vpop.f32.mrb[0].mxu1  ;;  %v368_v17 = vpop.f32.mrb[1].mxu0 }
  0xf5   : > { %v447_v18 = vadd.f32 %v806_v16, %v1107_v13  ;;  %v437_v19 = vadd.f32 %v1107_v13, %v368_v17  ;;  %v400_v20 = vpop.f32.mrb[1].mxu1  ;;  %v799_v21 = vpop.f32.mrb[2].mxu0 }
  0xf6   : > { %vm455_vm4 = vcmp.gt.f32.partialorder %v439_v15, 0.0  ;;  %v471_v22 = vmul.f32 0.2, %v439_v15  ;;  %v445_v23 = vadd.f32 %v1107_v13, %v400_v20  ;;  %v440_v24 = vadd.f32 %v799_v21, %v1107_v13  ;;  %v807_v25 = vpop.f32.mrb[2].mxu1  ;;  %v371_v26 = vpop.f32.mrb[3].mxu0 }
  0xf7   : > { %vm463_vm5 = vcmp.gt.f32.partialorder %v447_v18, 0.0  ;;  %v479_v27 = vmul.f32 0.2, %v447_v18  ;;  %vm453_vm6 = vcmp.gt.f32.partialorder %v437_v19, 0.0  ;;  %v469_v28 = vmul.f32 0.2, %v437_v19 }
  0xf8   : > { %v487_v29 = vsel %vm455_vm4, %v439_v15, %v471_v22  ;;  %vm461_vm7 = vcmp.gt.f32.partialorder %v445_v23, 0.0  ;;  %v477_v30 = vmul.f32 0.2, %v445_v23  ;;  %vm456_vm8 = vcmp.gt.f32.partialorder %v440_v24, 0.0  ;;  %v403_v31 = vpop.f32.mrb[3].mxu1 }
  0xf9   : > { %v770_v32 = vpack.c.bf16 %v487_v29, %v487_v29  ;;  %v495_v33 = vsel %vm463_vm5, %v447_v18, %v479_v27  ;;  %v485_v34 = vsel %vm453_vm6, %v437_v19, %v469_v28  ;;  %v472_v35 = vmul.f32 0.2, %v440_v24 }
  0xfa   : > { %v778_v36 = vpack.c.bf16 %v495_v33, %v495_v33  ;;  %v768_v37 = vpack.c.bf16 %v485_v34, %v485_v34  ;;  %v493_v38 = vsel %vm461_vm7, %v445_v23, %v477_v30  ;;  %v448_v39 = vadd.f32 %v807_v25, %v1107_v13 }
  0xfb   : > { %568 = vst.msk [vmem:[%s1118_s5 + $0x8] sm:$0xf] %vm565_vm3, %v770_v32  ;;  %v776_v40 = vpack.c.bf16 %v493_v38, %v493_v38  ;;  %v488_v41 = vsel %vm456_vm8, %v440_v24, %v472_v35  ;;  %v438_v42 = vadd.f32 %v1107_v13, %v371_v26  ;;  %v446_v43 = vadd.f32 %v1107_v13, %v403_v31  ;;  %v802_v44 = vpop.f32.mrb[4].mxu0 }
  0xfc   : > { %576 = vst.msk [vmem:[%s1118_s5 + $0x28] sm:$0xf] %vm565_vm3, %v778_v36  ;;  %566 = vst.msk [vmem:[%s1118_s5] sm:$0xf] %vm565_vm3, %v768_v37  ;;  %v771_v45 = vpack.c.bf16 %v488_v41, %v488_v41  ;;  %vm464_vm9 = vcmp.gt.f32.partialorder %v448_v39, 0.0  ;;  %v443_v47 = vadd.f32 %v802_v44, %v1107_v13  ;;  %v810_v48 = vpop.f32.mrb[4].mxu1 }
  0xfd   : > { %v480_v46 = vmul.f32 0.2, %v448_v39  ;;  %v384_v49 = vpop.f32.mrb[5].mxu0  ;;  %574 = vst.msk [vmem:[%s1118_s5 + $0x20] sm:$0xf] %vm565_vm3, %v776_v40  ;;  %vm454_vm10 = vcmp.gt.f32.partialorder %v438_v42, 0.0  ;;  %v451_v54 = vadd.f32 %v810_v48, %v1107_v13 }
  0xfe   : > { %v470_v50 = vmul.f32 0.2, %v438_v42  ;;  %vm462_vm11 = vcmp.gt.f32.partialorder %v446_v43, 0.0  ;;  %v478_v51 = vmul.f32 0.2, %v446_v43  ;;  %vm459_vm12 = vcmp.gt.f32.partialorder %v443_v47, 0.0 }
  0xff   : > { %569 = vst.msk [vmem:[%s1118_s5 + $0xc] sm:$0xf] %vm565_vm3, %v771_v45  ;;  %v496_v52 = vsel %vm464_vm9, %v448_v39, %v480_v46  ;;  %v475_v53 = vmul.f32 0.2, %v443_v47  ;;  %v416_v55 = vpop.f32.mrb[5].mxu1  ;;  %v803_v56 = vpop.f32.mrb[6].mxu0  ;;  %v441_v60 = vadd.f32 %v1107_v13, %v384_v49 }
 0x100   : > { %v779_v57 = vpack.c.bf16 %v496_v52, %v496_v52  ;;  %v486_v58 = vsel %vm454_vm10, %v438_v42, %v470_v50  ;;  %v494_v59 = vsel %vm462_vm11, %v446_v43, %v478_v51  ;;  %v811_v61 = vpop.f32.mrb[6].mxu1  ;;  %v387_v62 = vpop.f32.mrb[7].mxu0  ;;  %vm467_vm13 = vcmp.gt.f32.partialorder %v451_v54, 0.0 }
 0x101   : > { %v769_v63 = vpack.c.bf16 %v486_v58, %v486_v58  ;;  %v777_v0 = vpack.c.bf16 %v494_v59, %v494_v59  ;;  %v491_v1 = vsel %vm459_vm12, %v443_v47, %v475_v53  ;;  %v419_v2 = vpop.f32.mrb[7].mxu1  ;;  %v483_v4 = vmul.f32 0.2, %v451_v54 }
 0x102   : > { %577 = vst.msk [vmem:[%s1118_s5 + $0x2c] sm:$0xf] %vm565_vm3, %v779_v57  ;;  %v774_v3 = vpack.c.bf16 %v491_v1, %v491_v1  ;;  %vm457_vm14 = vcmp.gt.f32.partialorder %v441_v60, 0.0  ;;  %v473_v5 = vmul.f32 0.2, %v441_v60  ;;  %v449_v6 = vadd.f32 %v1107_v13, %v416_v55 }
 0x103   : > { %567 = vst.msk [vmem:[%s1118_s5 + $0x4] sm:$0xf] %vm565_vm3, %v769_v63  ;;  %575 = vst.msk [vmem:[%s1118_s5 + $0x24] sm:$0xf] %vm565_vm3, %v777_v0  ;;  %v444_v7 = vadd.f32 %v803_v56, %v1107_v13  ;;  %v452_v8 = vadd.f32 %v811_v61, %v1107_v13  ;;  %v442_v9 = vadd.f32 %v1107_v13, %v387_v62 }
 0x104   : > { %572 = vst.msk [vmem:[%s1118_s5 + $0x18] sm:$0xf] %vm565_vm3, %v774_v3  ;;  %v499_v10 = vsel %vm467_vm13, %v451_v54, %v483_v4  ;;  %v489_v11 = vsel %vm457_vm14, %v441_v60, %v473_v5  ;;  %v450_v12 = vadd.f32 %v1107_v13, %v419_v2  ;;  %vm465_vm15 = vcmp.gt.f32.partialorder %v449_v6, 0.0 }
 0x105   : > { %v782_v14 = vpack.c.bf16 %v499_v10, %v499_v10  ;;  %v772_v15 = vpack.c.bf16 %v489_v11, %v489_v11  ;;  %v481_v16 = vmul.f32 0.2, %v449_v6  ;;  %vm460_vm0 = vcmp.gt.f32.partialorder %v444_v7, 0.0 }
 0x106   : > { %v476_v17 = vmul.f32 0.2, %v444_v7  ;;  %vm468_vm1 = vcmp.gt.f32.partialorder %v452_v8, 0.0  ;;  %v484_v18 = vmul.f32 0.2, %v452_v8  ;;  %vm458_vm2 = vcmp.gt.f32.partialorder %v442_v9, 0.0 }
 0x107   : > { %580 = vst.msk [vmem:[%s1118_s5 + $0x38] sm:$0xf] %vm565_vm3, %v782_v14  ;;  %570 = vst.msk [vmem:[%s1118_s5 + $0x10] sm:$0xf] %vm565_vm3, %v772_v15  ;;  %v497_v19 = vsel %vm465_vm15, %v449_v6, %v481_v16  ;;  %v474_v20 = vmul.f32 0.2, %v442_v9 }
 0x108   : > { %vm466_vm4 = vcmp.gt.f32.partialorder %v450_v12, 0.0  ;;  %v780_v13 = vpack.c.bf16 %v497_v19, %v497_v19  ;;  %v492_v21 = vsel %vm460_vm0, %v444_v7, %v476_v17  ;;  %v500_v22 = vsel %vm468_vm1, %v452_v8, %v484_v18 }
 0x109   : > { %v482_v23 = vmul.f32 0.2, %v450_v12  ;;  %v775_v24 = vpack.c.bf16 %v492_v21, %v492_v21  ;;  %v783_v25 = vpack.c.bf16 %v500_v22, %v500_v22  ;;  %v490_v26 = vsel %vm458_vm2, %v442_v9, %v474_v20 }
 0x10a   : > { %578 = vst.msk [vmem:[%s1118_s5 + $0x30] sm:$0xf] %vm565_vm3, %v780_v13  ;;  %v773_v27 = vpack.c.bf16 %v490_v26, %v490_v26 }
 0x10b   : > { %v498_v28 = vsel %vm466_vm4, %v450_v12, %v482_v23  ;;  %573 = vst.msk [vmem:[%s1118_s5 + $0x1c] sm:$0xf] %vm565_vm3, %v775_v24  ;;  %581 = vst.msk [vmem:[%s1118_s5 + $0x3c] sm:$0xf] %vm565_vm3, %v783_v25 }
 0x10c   : > { %v781_v29 = vpack.c.bf16 %v498_v28, %v498_v28  ;;  %571 = vst.msk [vmem:[%s1118_s5 + $0x14] sm:$0xf] %vm565_vm3, %v773_v27 }
 0x10e   : > { %579 = vst.msk [vmem:[%s1118_s5 + $0x34] sm:$0xf] %vm565_vm3, %v781_v29 }
 0x10f   : > { %909 = shalt.err (!%p906_p7)
}
 0x110   : > { %s910_s29 = scalar_lea.hbm %s1161_s11, 1024  ;;  %s914_s6 = scalar_lea.hbm %s1230_s3, 4096 }
 0x111   : > { %p911_p9 = scmp.ne.s32.totalorder %s1161_s11, %s910_s29  ;;  %p915_p12 = scmp.lt.u32.totalorder %s1161_s11, %s1230_s3 }
 0x112   : > { %p916_p13 = scmp.lt.u32.totalorder %s914_s6, %s910_s29  ;;  %p918_p1 = scmp.lt.u32.totalorder %s910_s29, %s1161_s11 }
 0x113   : > { %p912_p10 = pnand %p911_p9, %p1067_p3 }
 0x114   : > { %p917_p0 = por %p916_p13, %p915_p12 }
 0x115   : > { %p913_p11 = pneg %p912_p10 }
 0x116   : > { %p919_p2 = por %p918_p1, %p917_p0 }
 0x118   : > { %p920_p4 = pnand %p919_p2, %p913_p11 }
 0x11a   : > { %923 = shalt.err (!%p920_p4)
}
 0x11b   : > { %s994_s16 = smov 64   ;;  %s995_s9 = smov 4  }
 0x11c   : > { %814 = dma.vmem_to_hbm [thread:$0]  (%p1067_p3), %s1163_s8, 1024, %s1161_s11, %s1175_s20, %s994_s16, %s994_s16, %s995_s9  }
 0x11d PF: > { %p820_p5 = scmp.ge.s32.totalorder %s990_s19, 2  ;;  %s615_s10 = sand.u32 1, %s962_s12  }
 0x11e   : > { %s616_s21 = scalar_lea.sflag [#allocation3], %s615_s10 }
 0x11f   : > { %p817_p6 = pnand %p820_p5, %p1076_p8 }
 0x121   : > { %957 = dma.done.wait (!%p817_p6), %s616_s21, 1024  }
 0x122   : > { %959 = vsyncadd (!%p817_p6), %s616_s21, 4294966272  ;;  %s16_s19 = sadd.s32 1, %s990_s19   ;;  %s1233_s12 = smov %s966_s13 }
 0x123   : > { %p13_p7 = scmp.ge.s32.totalorder %s16_s19, 6   ;;  %s1234_s13 = smov %s970_s14 }
 0x124   : > { %s1235_s14 = smov %s1085_s30  ;;  %s1236_s15 = smov %s982_s17 }
 0x125   : > { %s1237_s16 = smov %s986_s18  ;;  %s1238_s17 = smov %s1241_s22 }
 0x126   : > { %s1239_s18 = smov %s1245_s23  ;;  %15 = sbr.rel (!%p13_p7) target bundleno = 5 (0x5), region = 73 }
 0x12d   :  { %621 = vsyncpa [#allocation3], 1 }
 0x12e   :  { %623 = vsyncpa [#allocation3 + $0x1], 1 }

</bundles_post_ra>
